<compile_context>
chip_gen: v5e
topology: v5e:2x2
jax: 0.10.0
libtpu: 0.0.40
codegen_flags: <defaults>
</compile_context>

<pallas_src>
import jax
import jax.numpy as jnp
from jax.experimental import pallas as pl
from jax.experimental.pallas import tpu as pltpu

NEG_SLOPE = 0.01  # nn.LeakyReLU default
LANE = 128
SUBLANE = 8


def _leaky_relu(v):
    return jnp.where(v > 0, v, NEG_SLOPE * v)


def _round_up(x, m):
    return ((x + m - 1) // m) * m


def make_encoder_kernel(nk, lp_list, batch, c_out):
    """Encoder: conv banks (im2col matmuls) + max-pool + heads + cat2emb -> emb."""

    def kernel(*refs):
        emb_ref = refs[-1]
        refs = refs[:-1]
        idx = 0
        win = refs[idx:idx + nk]; idx += nk            # [B*LP_i, K_i*C_in] im2col operands
        x_nd_ref = refs[idx]; idx += 1                 # [B, net_dim + desc_dim]
        cw = refs[idx:idx + nk]; idx += nk             # [K_i*C_in, C_out]
        cb = refs[idx:idx + nk]; idx += nk             # [1, C_out]
        wseq = refs[idx:idx + nk]; idx += nk           # [C_out, hidden] (split of fc_seq weight)
        (b_seq_ref, w_nd_ref, b_nd_ref,
         w_cat_s_ref, w_cat_nd_ref, b_cat_ref) = refs[idx:idx + 6]

        # ---- 'seqs' branch: one matmul per conv kernel size, max-pool over positions,
        #      fc_seq folded in via per-bank weight splits (no activation concat) ----
        acc = None
        for i in range(nk):
            c = jnp.dot(win[i][...], cw[i][...],
                        preferred_element_type=jnp.float32)          # [B*LP_i, C_out]
            c = c.reshape(batch, lp_list[i], c_out)                   # sublane-aligned split
            pooled = jnp.max(c, axis=1) + cb[i][...]                  # [B, C_out]
            d = jnp.dot(pooled, wseq[i][...],
                        preferred_element_type=jnp.float32)           # [B, hidden]
            acc = d if acc is None else acc + d
        h_seq = _leaky_relu(acc + b_seq_ref[...])                     # [B, hidden]

        # ---- 'network' + 'description' heads fused into one block-diagonal dot ----
        h_nd = _leaky_relu(
            jnp.dot(x_nd_ref[...], w_nd_ref[...],
                    preferred_element_type=jnp.float32) + b_nd_ref[...])   # [B, 2*hidden]

        # ---- cat2emb via weight splitting; columns padded to lane-dense text_dim ----
        emb_ref[...] = (
            jnp.dot(h_seq, w_cat_s_ref[...], preferred_element_type=jnp.float32)
            + jnp.dot(h_nd, w_cat_nd_ref[...], preferred_element_type=jnp.float32)
            + b_cat_ref[...])                                          # [B, TD_pad]

    return kernel


def logits_kernel(emb_ref, texts_ref, out_ref):
    """Per-tile logits against the (lane-dense) text table + sigmoid."""
    logits = jnp.dot(emb_ref[...], texts_ref[...],
                     preferred_element_type=jnp.float32)               # [B, TN]
    e = jnp.exp(-logits)                                               # EUP
    out_ref[...] = pl.reciprocal(1.0 + e, approx=True)                 # EUP, off the VALU


def biotranslator_forward(x_seq_ncl, x_desc, x_vec, texts,
                          conv_ws, conv_bs, w_seq, b_seq, w_net, b_net,
                          w_desc, b_desc, w_cat, b_cat, kernel_sizes):
    """Wrapper: layout plumbing (im2col, weight splits, lane-dense padding) + 2 pallas_calls."""
    B, c_in, L = x_seq_ncl.shape
    n_texts, text_dim = texts.shape
    hidden = w_seq.shape[1]
    c_out = conv_bs[0].shape[1]
    net_dim = w_net.shape[0]
    desc_dim = w_desc.shape[0]
    nk = len(kernel_sizes)

    x_nlc = jnp.transpose(x_seq_ncl, (0, 2, 1))                        # [B, L, C_in]

    # im2col (pure layout; padded rows replicate a valid window so the max is unchanged)
    win_flats, cw_mats, lp_list = [], [], []
    for i, K in enumerate(kernel_sizes):
        l_out = L - K + 1
        lp = _round_up(l_out, SUBLANE)
        w = jnp.stack([x_nlc[:, j:j + l_out, :] for j in range(K)], axis=2)  # [B, L_out, K, C_in]
        w = w.reshape(B, l_out, K * c_in)
        if lp > l_out:
            pad = jnp.broadcast_to(w[:, :1, :], (B, lp - l_out, K * c_in))
            w = jnp.concatenate([w, pad], axis=1)
        win_flats.append(w.reshape(B * lp, K * c_in))
        cw_mats.append(conv_ws[i].reshape(K * c_in, c_out))
        lp_list.append(lp)

    # fused network+description head: block-diagonal weight (feature order seqs,network,description)
    x_nd = jnp.concatenate([x_vec, x_desc], axis=1)                    # [B, net+desc]
    w_nd = jnp.concatenate(
        [jnp.concatenate([w_net, jnp.zeros((net_dim, hidden), jnp.float32)], axis=1),
         jnp.concatenate([jnp.zeros((desc_dim, hidden), jnp.float32), w_desc], axis=1)],
        axis=0)                                                        # [net+desc, 2*hidden]
    b_nd = jnp.concatenate([b_net, b_desc], axis=1)                    # [1, 2*hidden]

    # split fc_seq / cat2emb weights so no activation concat happens in-kernel;
    # pad cat2emb columns to a lane-dense text_dim (padded emb columns are exactly 0)
    wseq_splits = [w_seq[i * c_out:(i + 1) * c_out] for i in range(nk)]
    td_pad = _round_up(text_dim, LANE)
    pad_td = td_pad - text_dim
    w_cat_s = jnp.pad(w_cat[:hidden], ((0, 0), (0, pad_td)))
    w_cat_nd = jnp.pad(w_cat[hidden:], ((0, 0), (0, pad_td)))
    b_cat_p = jnp.pad(b_cat, ((0, 0), (0, pad_td)))

    enc_inputs = (list(win_flats) + [x_nd] + list(cw_mats) + list(conv_bs)
                  + wseq_splits + [b_seq, w_nd, b_nd, w_cat_s, w_cat_nd, b_cat_p])

    def full_spec(a):
        nd = a.ndim
        return pl.BlockSpec(tuple(a.shape), lambda i, _nd=nd: (0,) * _nd)

    # ---- call 1: encoder (runs exactly once; no redundant recompute per text tile) ----
    enc_flops = 0
    for i, K in enumerate(kernel_sizes):
        enc_flops += 2 * (B * lp_list[i]) * (K * c_in) * c_out + 2 * B * c_out * hidden
    enc_flops += 2 * B * x_nd.shape[1] * w_nd.shape[1]
    enc_flops += 2 * B * hidden * td_pad + 2 * B * (2 * hidden) * td_pad
    enc_bytes = sum(int(a.size) * 4 for a in enc_inputs) + B * td_pad * 4
    enc_cost = pl.CostEstimate(flops=enc_flops, transcendentals=0,
                               bytes_accessed=enc_bytes)

    emb = pl.pallas_call(
        make_encoder_kernel(nk, lp_list, B, c_out),
        out_shape=jax.ShapeDtypeStruct((B, td_pad), jnp.float32),
        grid=(1,),
        in_specs=[full_spec(a) for a in enc_inputs],
        out_specs=pl.BlockSpec((B, td_pad), lambda i: (0, 0)),
        compiler_params=pltpu.CompilerParams(dimension_semantics=("arbitrary",)),
        cost_estimate=enc_cost,
    )(*enc_inputs)

    # ---- call 2: logits + sigmoid, tiled (parallel) over a lane-dense text table ----
    tn = 512 if n_texts >= 512 else LANE
    nt_pad = _round_up(n_texts, tn)
    texts_t = jnp.transpose(texts, (1, 0))                             # == texts.permute(1, 0)
    texts_pad = jnp.pad(texts_t, ((0, pad_td), (0, nt_pad - n_texts)))

    log_flops = 2 * B * td_pad * nt_pad
    log_bytes = 4 * (B * td_pad + td_pad * nt_pad + B * nt_pad)
    log_cost = pl.CostEstimate(flops=log_flops, transcendentals=B * nt_pad,
                               bytes_accessed=log_bytes)

    out_pad = pl.pallas_call(
        logits_kernel,
        out_shape=jax.ShapeDtypeStruct((B, nt_pad), jnp.float32),
        grid=(nt_pad // tn,),
        in_specs=[pl.BlockSpec((B, td_pad), lambda j: (0, 0)),
                  pl.BlockSpec((td_pad, tn), lambda j: (0, j))],
        out_specs=pl.BlockSpec((B, tn), lambda j: (0, j)),
        compiler_params=pltpu.CompilerParams(dimension_semantics=("parallel",)),
        cost_estimate=log_cost,
    )(emb, texts_pad)
    return out_pad[:, :n_texts]


def _xavier(key, shape, fan_in, fan_out):
    scale = jnp.sqrt(2.0 / (fan_in + fan_out)).astype(jnp.float32)
    return scale * jax.random.normal(key, shape, jnp.float32)


def _reference_forward(x_seq_ncl, x_desc, x_vec, texts, conv_ws, conv_bs,
                       w_seq, b_seq, w_net, b_net, w_desc, b_desc, w_cat, b_cat,
                       kernel_sizes):
    """Pure-JAX reference mirroring the PyTorch semantics (NCL conv)."""
    pooled = []
    for i, K in enumerate(kernel_sizes):
        w_oik = jnp.transpose(conv_ws[i], (2, 1, 0))                   # [C_out, C_in, K]
        conv = jax.lax.conv_general_dilated(
            x_seq_ncl, w_oik, window_strides=(1,), padding='VALID',
            dimension_numbers=('NCH', 'OIH', 'NCH'))
        conv = conv + conv_bs[i].reshape(1, -1, 1)
        pooled.append(jnp.max(conv, axis=-1))                          # [B, C_out]
    seq_cat = jnp.concatenate(pooled, axis=1)

    def leaky(v):
        return jnp.where(v > 0, v, NEG_SLOPE * v)

    h_seq = leaky(seq_cat @ w_seq + b_seq)
    h_net = leaky(x_vec @ w_net + b_net)
    h_desc = leaky(x_desc @ w_desc + b_desc)
    emb = jnp.concatenate([h_seq, h_net, h_desc], axis=1) @ w_cat + b_cat
    logits = emb @ texts.T
    return jax.nn.sigmoid(logits)


if __name__ == "__main__":
    # small, module-consistent shapes
    B = 2
    C_in = 4            # seq_input_nc
    C_out = 8           # seq_in_nc
    L = 32              # max_length
    seq_max_kernels = 17
    kernel_sizes = list(range(8, seq_max_kernels, 8))   # [8, 16]
    hidden = 32         # hidden_dim
    net_dim = 16        # network_dim
    desc_dim = 16       # description_dim
    text_dim = 16       # term_enc_dim
    n_texts = 8

    keys = iter(jax.random.split(jax.random.PRNGKey(0), 64))

    # inputs (PyTorch conv layout NCL for the sequence)
    x_seq_ncl = jax.random.normal(next(keys), (B, C_in, L), jnp.float32)
    x_desc = jax.random.normal(next(keys), (B, desc_dim), jnp.float32)
    x_vec = jax.random.normal(next(keys), (B, net_dim), jnp.float32)
    texts = jax.random.normal(next(keys), (n_texts, text_dim), jnp.float32)

    # deterministic xavier-style parameters (conv weights stored [K, C_in, C_out];
    # linear weights stored [in, out])
    conv_ws, conv_bs = [], []
    for K in kernel_sizes:
        conv_ws.append(_xavier(next(keys), (K, C_in, C_out), C_in * K, C_out))
        conv_bs.append(0.01 * jax.random.normal(next(keys), (1, C_out), jnp.float32))

    seq_in_dim = len(kernel_sizes) * C_out
    w_seq = _xavier(next(keys), (seq_in_dim, hidden), seq_in_dim, hidden)
    b_seq = 0.01 * jax.random.normal(next(keys), (1, hidden), jnp.float32)
    w_net = _xavier(next(keys), (net_dim, hidden), net_dim, hidden)
    b_net = 0.01 * jax.random.normal(next(keys), (1, hidden), jnp.float32)
    w_desc = _xavier(next(keys), (desc_dim, hidden), desc_dim, hidden)
    b_desc = 0.01 * jax.random.normal(next(keys), (1, hidden), jnp.float32)
    cat_in = 3 * hidden
    w_cat = _xavier(next(keys), (cat_in, text_dim), cat_in, text_dim)
    b_cat = 0.01 * jax.random.normal(next(keys), (1, text_dim), jnp.float32)

    out = biotranslator_forward(x_seq_ncl, x_desc, x_vec, texts,
                                conv_ws, conv_bs, w_seq, b_seq, w_net, b_net,
                                w_desc, b_desc, w_cat, b_cat, kernel_sizes)
    out = jax.block_until_ready(out)

    ref = _reference_forward(x_seq_ncl, x_desc, x_vec, texts, conv_ws, conv_bs,
                             w_seq, b_seq, w_net, b_net, w_desc, b_desc,
                             w_cat, b_cat, kernel_sizes)
    ref = jax.block_until_ready(ref)

    assert out.shape == (B, n_texts)
    assert jnp.allclose(out, ref, atol=5e-3, rtol=5e-3), (out, ref)

    # TODO(synk): BCELoss, Dropout ('expression'/'vec' branch) and the trainable
    # temperature are not part of the 'seq' forward path and are not modeled.
    print("KERNEL_OK")
</pallas_src>

<mosaic_0001>
module attributes {stable_mosaic.version = 11 : i64} {
  func.func @kernel(%arg0: i32, %arg1: memref<64x32xf32, #tpu.memory_space<vmem>>, %arg2: memref<48x64xf32, #tpu.memory_space<vmem>>, %arg3: memref<2x32xf32, #tpu.memory_space<vmem>>, %arg4: memref<32x8xf32, #tpu.memory_space<vmem>>, %arg5: memref<64x8xf32, #tpu.memory_space<vmem>>, %arg6: memref<1x8xf32, #tpu.memory_space<vmem>>, %arg7: memref<1x8xf32, #tpu.memory_space<vmem>>, %arg8: memref<8x32xf32, #tpu.memory_space<vmem>>, %arg9: memref<8x32xf32, #tpu.memory_space<vmem>>, %arg10: memref<1x32xf32, #tpu.memory_space<vmem>>, %arg11: memref<32x64xf32, #tpu.memory_space<vmem>>, %arg12: memref<1x64xf32, #tpu.memory_space<vmem>>, %arg13: memref<32x128xf32, #tpu.memory_space<vmem>>, %arg14: memref<64x128xf32, #tpu.memory_space<vmem>>, %arg15: memref<1x128xf32, #tpu.memory_space<vmem>>, %arg16: memref<2x128xf32, #tpu.memory_space<vmem>>) attributes {dimension_semantics = [#tpu.dimension_semantics<arbitrary>], iteration_bounds = array<i64: 1>, scalar_prefetch = 0 : i64, scratch_operands = 0 : i64, tpu.core_type = #tpu.core_type<tc>, window_params = [{pipeline_mode = #tpu.pipeline_mode<synchronous>, transform_indices = @transform_0, window_bounds = array<i64: 64, 32>}, {pipeline_mode = #tpu.pipeline_mode<synchronous>, transform_indices = @transform_1, window_bounds = array<i64: 48, 64>}, {pipeline_mode = #tpu.pipeline_mode<synchronous>, transform_indices = @transform_2, window_bounds = array<i64: 2, 32>}, {pipeline_mode = #tpu.pipeline_mode<synchronous>, transform_indices = @transform_3, window_bounds = array<i64: 32, 8>}, {pipeline_mode = #tpu.pipeline_mode<synchronous>, transform_indices = @transform_4, window_bounds = array<i64: 64, 8>}, {pipeline_mode = #tpu.pipeline_mode<synchronous>, transform_indices = @transform_5, window_bounds = array<i64: 1, 8>}, {pipeline_mode = #tpu.pipeline_mode<synchronous>, transform_indices = @transform_6, window_bounds = array<i64: 1, 8>}, {pipeline_mode = #tpu.pipeline_mode<synchronous>, transform_indices = @transform_7, window_bounds = array<i64: 8, 32>}, {pipeline_mode = #tpu.pipeline_mode<synchronous>, transform_indices = @transform_8, window_bounds = array<i64: 8, 32>}, {pipeline_mode = #tpu.pipeline_mode<synchronous>, transform_indices = @transform_9, window_bounds = array<i64: 1, 32>}, {pipeline_mode = #tpu.pipeline_mode<synchronous>, transform_indices = @transform_10, window_bounds = array<i64: 32, 64>}, {pipeline_mode = #tpu.pipeline_mode<synchronous>, transform_indices = @transform_11, window_bounds = array<i64: 1, 64>}, {pipeline_mode = #tpu.pipeline_mode<synchronous>, transform_indices = @transform_12, window_bounds = array<i64: 32, 128>}, {pipeline_mode = #tpu.pipeline_mode<synchronous>, transform_indices = @transform_13, window_bounds = array<i64: 64, 128>}, {pipeline_mode = #tpu.pipeline_mode<synchronous>, transform_indices = @transform_14, window_bounds = array<i64: 1, 128>}, {pipeline_mode = #tpu.pipeline_mode<synchronous>, transform_indices = @transform_15, window_bounds = array<i64: 2, 128>}]} {
    %c0 = arith.constant 0 : index
    %c0_0 = arith.constant 0 : index
    %0 = vector.load %arg1[%c0, %c0_0] : memref<64x32xf32, #tpu.memory_space<vmem>>, vector<64x32xf32>
    %c0_1 = arith.constant 0 : index
    %c0_2 = arith.constant 0 : index
    %1 = vector.load %arg4[%c0_1, %c0_2] : memref<32x8xf32, #tpu.memory_space<vmem>>, vector<32x8xf32>
    %cst = arith.constant dense<0.000000e+00> : vector<64x8xf32>
    %2 = tpu.matmul %0, %1, %cst {dimension_numbers = #tpu.dot_dimension_numbers<[1], [0], [0], [1], [0, 0, 1, 1], [], []>} : vector<64x32xf32>, vector<32x8xf32>, vector<64x8xf32> -> vector<64x8xf32>
    %3 = vector.shape_cast %2 : vector<64x8xf32> to vector<2x32x8xf32>
    %cst_3 = arith.constant dense<0xFF800000> : vector<2x8xf32>
    %4 = vector.multi_reduction <maximumf>, %3, %cst_3 [1] : vector<2x32x8xf32> to vector<2x8xf32>
    %c0_4 = arith.constant 0 : index
    %c0_5 = arith.constant 0 : index
    %5 = vector.load %arg6[%c0_4, %c0_5] : memref<1x8xf32, #tpu.memory_space<vmem>>, vector<1x8xf32>
    %6 = vector.broadcast %5 : vector<1x8xf32> to vector<2x8xf32>
    %7 = arith.addf %4, %6 : vector<2x8xf32>
    %c0_6 = arith.constant 0 : index
    %c0_7 = arith.constant 0 : index
    %8 = vector.load %arg8[%c0_6, %c0_7] : memref<8x32xf32, #tpu.memory_space<vmem>>, vector<8x32xf32>
    %cst_8 = arith.constant dense<0.000000e+00> : vector<2x32xf32>
    %9 = tpu.matmul %7, %8, %cst_8 {dimension_numbers = #tpu.dot_dimension_numbers<[1], [0], [0], [1], [0, 0, 1, 1], [], []>} : vector<2x8xf32>, vector<8x32xf32>, vector<2x32xf32> -> vector<2x32xf32>
    %c0_9 = arith.constant 0 : index
    %c0_10 = arith.constant 0 : index
    %10 = vector.load %arg2[%c0_9, %c0_10] : memref<48x64xf32, #tpu.memory_space<vmem>>, vector<48x64xf32>
    %c0_11 = arith.constant 0 : index
    %c0_12 = arith.constant 0 : index
    %11 = vector.load %arg5[%c0_11, %c0_12] : memref<64x8xf32, #tpu.memory_space<vmem>>, vector<64x8xf32>
    %cst_13 = arith.constant dense<0.000000e+00> : vector<48x8xf32>
    %12 = tpu.matmul %10, %11, %cst_13 {dimension_numbers = #tpu.dot_dimension_numbers<[1], [0], [0], [1], [0, 0, 1, 1], [], []>} : vector<48x64xf32>, vector<64x8xf32>, vector<48x8xf32> -> vector<48x8xf32>
    %13 = vector.shape_cast %12 : vector<48x8xf32> to vector<2x24x8xf32>
    %cst_14 = arith.constant dense<0xFF800000> : vector<2x8xf32>
    %14 = vector.multi_reduction <maximumf>, %13, %cst_14 [1] : vector<2x24x8xf32> to vector<2x8xf32>
    %c0_15 = arith.constant 0 : index
    %c0_16 = arith.constant 0 : index
    %15 = vector.load %arg7[%c0_15, %c0_16] : memref<1x8xf32, #tpu.memory_space<vmem>>, vector<1x8xf32>
    %16 = vector.broadcast %15 : vector<1x8xf32> to vector<2x8xf32>
    %17 = arith.addf %14, %16 : vector<2x8xf32>
    %c0_17 = arith.constant 0 : index
    %c0_18 = arith.constant 0 : index
    %18 = vector.load %arg9[%c0_17, %c0_18] : memref<8x32xf32, #tpu.memory_space<vmem>>, vector<8x32xf32>
    %cst_19 = arith.constant dense<0.000000e+00> : vector<2x32xf32>
    %19 = tpu.matmul %17, %18, %cst_19 {dimension_numbers = #tpu.dot_dimension_numbers<[1], [0], [0], [1], [0, 0, 1, 1], [], []>} : vector<2x8xf32>, vector<8x32xf32>, vector<2x32xf32> -> vector<2x32xf32>
    %20 = arith.addf %9, %19 : vector<2x32xf32>
    %c0_20 = arith.constant 0 : index
    %c0_21 = arith.constant 0 : index
    %21 = vector.load %arg10[%c0_20, %c0_21] : memref<1x32xf32, #tpu.memory_space<vmem>>, vector<1x32xf32>
    %22 = vector.broadcast %21 : vector<1x32xf32> to vector<2x32xf32>
    %23 = arith.addf %20, %22 : vector<2x32xf32>
    %cst_22 = arith.constant 0.000000e+00 : f32
    %24 = vector.broadcast %cst_22 : f32 to vector<2x32xf32>
    %25 = arith.cmpf ogt, %23, %24 : vector<2x32xf32>
    %cst_23 = arith.constant 0.00999999977 : f32
    %26 = vector.broadcast %cst_23 : f32 to vector<2x32xf32>
    %27 = arith.mulf %26, %23 : vector<2x32xf32>
    %28 = arith.select %25, %23, %27 : vector<2x32xi1>, vector<2x32xf32>
    %c0_24 = arith.constant 0 : index
    %c0_25 = arith.constant 0 : index
    %29 = vector.load %arg3[%c0_24, %c0_25] : memref<2x32xf32, #tpu.memory_space<vmem>>, vector<2x32xf32>
    %c0_26 = arith.constant 0 : index
    %c0_27 = arith.constant 0 : index
    %30 = vector.load %arg11[%c0_26, %c0_27] : memref<32x64xf32, #tpu.memory_space<vmem>>, vector<32x64xf32>
    %cst_28 = arith.constant dense<0.000000e+00> : vector<2x64xf32>
    %31 = tpu.matmul %29, %30, %cst_28 {dimension_numbers = #tpu.dot_dimension_numbers<[1], [0], [0], [1], [0, 0, 1, 1], [], []>} : vector<2x32xf32>, vector<32x64xf32>, vector<2x64xf32> -> vector<2x64xf32>
    %c0_29 = arith.constant 0 : index
    %c0_30 = arith.constant 0 : index
    %32 = vector.load %arg12[%c0_29, %c0_30] : memref<1x64xf32, #tpu.memory_space<vmem>>, vector<1x64xf32>
    %33 = vector.broadcast %32 : vector<1x64xf32> to vector<2x64xf32>
    %34 = arith.addf %31, %33 : vector<2x64xf32>
    %cst_31 = arith.constant 0.000000e+00 : f32
    %35 = vector.broadcast %cst_31 : f32 to vector<2x64xf32>
    %36 = arith.cmpf ogt, %34, %35 : vector<2x64xf32>
    %cst_32 = arith.constant 0.00999999977 : f32
    %37 = vector.broadcast %cst_32 : f32 to vector<2x64xf32>
    %38 = arith.mulf %37, %34 : vector<2x64xf32>
    %39 = arith.select %36, %34, %38 : vector<2x64xi1>, vector<2x64xf32>
    %c0_33 = arith.constant 0 : index
    %c0_34 = arith.constant 0 : index
    %40 = vector.load %arg13[%c0_33, %c0_34] : memref<32x128xf32, #tpu.memory_space<vmem>>, vector<32x128xf32>
    %cst_35 = arith.constant dense<0.000000e+00> : vector<2x128xf32>
    %41 = tpu.matmul %28, %40, %cst_35 {dimension_numbers = #tpu.dot_dimension_numbers<[1], [0], [0], [1], [0, 0, 1, 1], [], []>} : vector<2x32xf32>, vector<32x128xf32>, vector<2x128xf32> -> vector<2x128xf32>
    %c0_36 = arith.constant 0 : index
    %c0_37 = arith.constant 0 : index
    %42 = vector.load %arg14[%c0_36, %c0_37] : memref<64x128xf32, #tpu.memory_space<vmem>>, vector<64x128xf32>
    %cst_38 = arith.constant dense<0.000000e+00> : vector<2x128xf32>
    %43 = tpu.matmul %39, %42, %cst_38 {dimension_numbers = #tpu.dot_dimension_numbers<[1], [0], [0], [1], [0, 0, 1, 1], [], []>} : vector<2x64xf32>, vector<64x128xf32>, vector<2x128xf32> -> vector<2x128xf32>
    %44 = arith.addf %41, %43 : vector<2x128xf32>
    %c0_39 = arith.constant 0 : index
    %c0_40 = arith.constant 0 : index
    %45 = vector.load %arg15[%c0_39, %c0_40] : memref<1x128xf32, #tpu.memory_space<vmem>>, vector<1x128xf32>
    %46 = vector.broadcast %45 : vector<1x128xf32> to vector<2x128xf32>
    %47 = arith.addf %44, %46 : vector<2x128xf32>
    %c0_41 = arith.constant 0 : index
    %c0_42 = arith.constant 0 : index
    %48 = vector.load %arg16[%c0_41, %c0_42] : memref<2x128xf32, #tpu.memory_space<vmem>>, vector<2x128xf32>
    tpu.vector_store %arg16[%c0_41, %c0_42], %47 {strides = array<i32>} : memref<2x128xf32, #tpu.memory_space<vmem>>, vector<2x128xf32>,
    return
  }
  func.func @transform_0(%arg0: i32) -> (i32, i32) {
    %c0_i32 = arith.constant 0 : i32
    %c0_i32_0 = arith.constant 0 : i32
    %c0_i32_1 = arith.constant 0 : i32
    return %c0_i32, %c0_i32_0 : i32, i32
  }
  func.func @transform_1(%arg0: i32) -> (i32, i32) {
    %c0_i32 = arith.constant 0 : i32
    %c0_i32_0 = arith.constant 0 : i32
    %c0_i32_1 = arith.constant 0 : i32
    return %c0_i32, %c0_i32_0 : i32, i32
  }
  func.func @transform_2(%arg0: i32) -> (i32, i32) {
    %c0_i32 = arith.constant 0 : i32
    %c0_i32_0 = arith.constant 0 : i32
    %c0_i32_1 = arith.constant 0 : i32
    return %c0_i32, %c0_i32_0 : i32, i32
  }
  func.func @transform_3(%arg0: i32) -> (i32, i32) {
    %c0_i32 = arith.constant 0 : i32
    %c0_i32_0 = arith.constant 0 : i32
    %c0_i32_1 = arith.constant 0 : i32
    return %c0_i32, %c0_i32_0 : i32, i32
  }
  func.func @transform_4(%arg0: i32) -> (i32, i32) {
    %c0_i32 = arith.constant 0 : i32
    %c0_i32_0 = arith.constant 0 : i32
    %c0_i32_1 = arith.constant 0 : i32
    return %c0_i32, %c0_i32_0 : i32, i32
  }
  func.func @transform_5(%arg0: i32) -> (i32, i32) {
    %c0_i32 = arith.constant 0 : i32
    %c0_i32_0 = arith.constant 0 : i32
    %c0_i32_1 = arith.constant 0 : i32
    return %c0_i32, %c0_i32_0 : i32, i32
  }
  func.func @transform_6(%arg0: i32) -> (i32, i32) {
    %c0_i32 = arith.constant 0 : i32
    %c0_i32_0 = arith.constant 0 : i32
    %c0_i32_1 = arith.constant 0 : i32
    return %c0_i32, %c0_i32_0 : i32, i32
  }
  func.func @transform_7(%arg0: i32) -> (i32, i32) {
    %c0_i32 = arith.constant 0 : i32
    %c0_i32_0 = arith.constant 0 : i32
    %c0_i32_1 = arith.constant 0 : i32
    return %c0_i32, %c0_i32_0 : i32, i32
  }
  func.func @transform_8(%arg0: i32) -> (i32, i32) {
    %c0_i32 = arith.constant 0 : i32
    %c0_i32_0 = arith.constant 0 : i32
    %c0_i32_1 = arith.constant 0 : i32
    return %c0_i32, %c0_i32_0 : i32, i32
  }
  func.func @transform_9(%arg0: i32) -> (i32, i32) {
    %c0_i32 = arith.constant 0 : i32
    %c0_i32_0 = arith.constant 0 : i32
    %c0_i32_1 = arith.constant 0 : i32
    return %c0_i32, %c0_i32_0 : i32, i32
  }
  func.func @transform_10(%arg0: i32) -> (i32, i32) {
    %c0_i32 = arith.constant 0 : i32
    %c0_i32_0 = arith.constant 0 : i32
    %c0_i32_1 = arith.constant 0 : i32
    return %c0_i32, %c0_i32_0 : i32, i32
  }
  func.func @transform_11(%arg0: i32) -> (i32, i32) {
    %c0_i32 = arith.constant 0 : i32
    %c0_i32_0 = arith.constant 0 : i32
    %c0_i32_1 = arith.constant 0 : i32
    return %c0_i32, %c0_i32_0 : i32, i32
  }
  func.func @transform_12(%arg0: i32) -> (i32, i32) {
    %c0_i32 = arith.constant 0 : i32
    %c0_i32_0 = arith.constant 0 : i32
    %c0_i32_1 = arith.constant 0 : i32
    return %c0_i32, %c0_i32_0 : i32, i32
  }
  func.func @transform_13(%arg0: i32) -> (i32, i32) {
    %c0_i32 = arith.constant 0 : i32
    %c0_i32_0 = arith.constant 0 : i32
    %c0_i32_1 = arith.constant 0 : i32
    return %c0_i32, %c0_i32_0 : i32, i32
  }
  func.func @transform_14(%arg0: i32) -> (i32, i32) {
    %c0_i32 = arith.constant 0 : i32
    %c0_i32_0 = arith.constant 0 : i32
    %c0_i32_1 = arith.constant 0 : i32
    return %c0_i32, %c0_i32_0 : i32, i32
  }
  func.func @transform_15(%arg0: i32) -> (i32, i32) {
    %c0_i32 = arith.constant 0 : i32
    %c0_i32_0 = arith.constant 0 : i32
    %c0_i32_1 = arith.constant 0 : i32
    return %c0_i32, %c0_i32_0 : i32, i32
  }
}

</mosaic_0001>

<bundles_post_ra>
// kernel: tpu_custom_call.1
= control target key start
LH: loop header
LB: loop body
LE: loop exit
PB: predicated region body
PF: predicated region fallthrough
CT: control target
= control target key end

     0   :  { %vm63_vm0 = vcmask 261120   ;;  %s766_s0 = inlined_call_operand.vmem [shape: f32[64,32], index: 0, kind: input, shape index: {}]   ;;  %s767_s1 = inlined_call_operand.vmem [shape: f32[48,64], index: 1, kind: input, shape index: {}]   ;;  %s768_s2 = inlined_call_operand.vmem [shape: f32[2,32], index: 2, kind: input, shape index: {}]   ;;  %s769_s3 = inlined_call_operand.vmem [shape: f32[32,8], index: 3, kind: input, shape index: {}]   ;;  %s770_s4 = inlined_call_operand.vmem [shape: f32[64,8], index: 4, kind: input, shape index: {}]   ;;  %s771_s5 = inlined_call_operand.vmem [shape: f32[1,8], index: 5, kind: input, shape index: {}]   ;;  %s772_s6 = inlined_call_operand.vmem [shape: f32[1,8], index: 6, kind: input, shape index: {}]   ;;  %s773_s7 = inlined_call_operand.vmem [shape: f32[8,32], index: 7, kind: input, shape index: {}]   ;;  %s774_s8 = inlined_call_operand.vmem [shape: f32[8,32], index: 8, kind: input, shape index: {}]   ;;  %s775_s9 = inlined_call_operand.vmem [shape: f32[1,32], index: 9, kind: input, shape index: {}]   ;;  %s776_s10 = inlined_call_operand.vmem [shape: f32[32,64], index: 10, kind: input, shape index: {}]   ;;  %s777_s11 = inlined_call_operand.vmem [shape: f32[1,64], index: 11, kind: input, shape index: {}]   ;;  %s778_s12 = inlined_call_operand.vmem [shape: f32[32,128], index: 12, kind: input, shape index: {}]   ;;  %s779_s13 = inlined_call_operand.vmem [shape: f32[64,128], index: 13, kind: input, shape index: {}]   ;;  %s780_s14 = inlined_call_operand.vmem [shape: f32[1,128], index: 14, kind: input, shape index: {}]   ;;  %s781_s15 = inlined_call_operand.hbm [shape: f32[2,128], index: 15, kind: output, shape index: {}]  }
   0x1   :  { %v62_v0 = vld [vmem:[%s769_s3 + $0x18] sm:$0xff]  ;;  %v61_v2 = vld [vmem:[%s769_s3 + $0x10] sm:$0xff]  ;;  %v60_v4 = vld [vmem:[%s769_s3 + $0x8] sm:$0xff] }
   0x2   :  { %v176_v1 = vld [vmem:[%s770_s4 + $0x38] sm:$0xff]  ;;  %100 = vmatpush.msra.mxu0 %v62_v0  ;;  %v175_v3 = vld [vmem:[%s770_s4 + $0x30] sm:$0xff]  ;;  %v174_v5 = vld [vmem:[%s770_s4 + $0x28] sm:$0xff]  ;;  %455 = vmatpush.msra.mxu2 %v62_v0 }
   0x3   :  { %204 = vmatpush.msra.mxu1 %v176_v1  ;;  %459 = vmatpush.msra.mxu3 %v176_v1  ;;  %v59_v6 = vld [vmem:[%s769_s3] sm:$0xff]  ;;  %v172_v9 = vld [vmem:[%s770_s4 + $0x18] sm:$0xff]  ;;  %v56_v10 = vld [vmem:[%s766_s0 + $0x28] sm:$0xff] }
   0x4   :  { %101 = vmatpush.msra.mxu0 %v61_v2  ;;  %v173_v7 = vld [vmem:[%s770_s4 + $0x20] sm:$0xff]  ;;  %456 = vmatpush.msra.mxu2 %v61_v2  ;;  %v171_v11 = vld [vmem:[%s770_s4 + $0x10] sm:$0xff]  ;;  %v170_v12 = vld [vmem:[%s770_s4 + $0x8] sm:$0xff] }
   0x5   :  { %205 = vmatpush.msra.mxu1 %v175_v3  ;;  %460 = vmatpush.msra.mxu3 %v175_v3  ;;  %v51_v8 = vld [vmem:[%s766_s0] sm:$0xff] }
   0x6   :  { %102 = vmatpush.msra.mxu0 %v60_v4  ;;  %457 = vmatpush.msra.mxu2 %v60_v4 }
   0x7   :  { %206 = vmatpush.msra.mxu1 %v174_v5  ;;  %461 = vmatpush.msra.mxu3 %v174_v5 }
   0x8   :  { %103 = vmatpush.msra.mxu0 %v59_v6  ;;  %458 = vmatpush.msra.mxu2 %v59_v6 }
   0x9   :  { %207 = vmatpush.msra.mxu1 %v173_v7  ;;  %436 = vmatmul.msk.f32.vlgmr.msra.gmra.mxu0 %vm63_vm0, %v51_v8 }
   0xa   :  { %441 = vmatmul.msk.f32.vlgmr.msra.gmra.mxu2 %vm63_vm0, %v56_v10  ;;  %462 = vmatpush.msra.mxu3 %v173_v7 }
   0xb   :  { %208 = vmatpush.msra.mxu1 %v172_v9 }
   0xc   :  { %20 = vsyncpa [#allocation3], 0  ;;  %v169_v13 = vld [vmem:[%s770_s4] sm:$0xff]  ;;  %463 = vmatpush.msra.mxu3 %v172_v9  ;;  %v52_v14 = vld [vmem:[%s766_s0 + $0x8] sm:$0xff]  ;;  %vm177_vm1 = vcmask 523264   ;;  %vm129_vm2 = vcmask 64512  }
   0xd   :  { %209 = vmatpush.msra.mxu1 %v171_v11  ;;  %v163_v15 = vld [vmem:[%s767_s1] sm:$0xff]  ;;  %v57_v16 = vld [vmem:[%s766_s0 + $0x30] sm:$0xff]  ;;  %v168_v17 = vld [vmem:[%s767_s1 + $0x28] sm:$0xff]  ;;  %vm263_vm3 = vcmask 1041409   ;;  %s427_s4 = sshll.u32 %s781_s15, 4  ;;  %s428_s4 = int_to_ptr.hbm [resolvable:$true] %s427_s4 }
   0xe   :  { %464 = vmatpush.msra.mxu3 %v171_v11  ;;  %v53_v18 = vld [vmem:[%s766_s0 + $0x10] sm:$0xff]  ;;  %v164_v19 = vld [vmem:[%s767_s1 + $0x8] sm:$0xff]  ;;  %v58_v20 = vld [vmem:[%s766_s0 + $0x38] sm:$0xff] }
   0xf   :  { %210 = vmatpush.msra.mxu1 %v170_v12  ;;  %v54_v21 = vld [vmem:[%s766_s0 + $0x18] sm:$0xff]  ;;  %v165_v22 = vld [vmem:[%s767_s1 + $0x10] sm:$0xff]  ;;  %v55_v23 = vld [vmem:[%s766_s0 + $0x20] sm:$0xff] }
  0x10   :  { %465 = vmatpush.msra.mxu3 %v170_v12  ;;  %v166_v24 = vld [vmem:[%s767_s1 + $0x18] sm:$0xff]  ;;  %v167_v25 = vld [vmem:[%s767_s1 + $0x20] sm:$0xff]  ;;  %v324_v50 = vld [vmem:[%s776_s10 + $0x10] sm:$0xff] }
  0x11   :  { %211 = vmatpush.msra.mxu1 %v169_v13  ;;  %437 = vmatmul.msk.f32.gmra.mxu0 %vm63_vm0, %v52_v14  ;;  %v259_v32 = vld [vmem:[%s774_s8] sm:$0xff]  ;;  %v325_v49 = vld [vmem:[%s776_s10 + $0x18] sm:$0xff]  ;;  %v323_v56 = vld [vmem:[%s776_s10 + $0x8] sm:$0xff] }
  0x12   :  { %444 = vmatmul.msk.f32.vlgmr.msra.gmra.mxu1 %vm177_vm1, %v163_v15  ;;  %442 = vmatmul.msk.f32.gmra.mxu2 %vm63_vm0, %v57_v16  ;;  %v162_v34 = vld [vmem:[%s773_s7] sm:$0xff] }
  0x13   :  { %466 = vmatpush.msra.mxu3 %v169_v13  ;;  %282 = vmatpush.msrb.mxu2 %v259_v32  ;;  %v322_v61 = vld [vmem:[%s776_s10] sm:$0xff] }
  0x14   :  { %449 = vmatmul.msk.f32.vlgmr.msra.gmra.mxu3 %vm177_vm1, %v168_v17 }
  0x15   :  { %308 = vmatpush.msrb.mxu3 %v162_v34  ;;  %345 = vmatpush.msra.mxu2 %v325_v49  ;;  %v356_v49 = vld [vmem:[%s778_s12] sm:$0xff] }
  0x17   :  { %346 = vmatpush.msra.mxu2 %v324_v50  ;;  %v362_v50 = vld [vmem:[%s779_s13 + $0x10] sm:$0xff] }
  0x19   :  { %438 = vmatmul.msk.f32.gmra.mxu0 %vm63_vm0, %v53_v18  ;;  %347 = vmatpush.msra.mxu2 %v323_v56 }
  0x1a   :  { %445 = vmatmul.msk.f32.gmra.mxu1 %vm177_vm1, %v164_v19  ;;  %443 = vmatmul.msk.f32.gmra.mxu2 %vm63_vm0, %v58_v20 }
  0x1b   :  { %348 = vmatpush.msra.mxu2 %v322_v61 }
  0x21   :  { %439 = vmatmul.msk.f32.gmra.mxu0 %vm63_vm0, %v54_v21 }
  0x22   :  { %446 = vmatmul.msk.f32.gmra.mxu1 %vm177_vm1, %v165_v22 }
  0x29   :  { %440 = vmatmul.msk.f32.gmra.mxu0 %vm63_vm0, %v55_v23 }
  0x2a   :  { %447 = vmatmul.msk.f32.gmra.mxu1 %vm177_vm1, %v166_v24 }
  0x32   :  { %448 = vmatmul.msk.f32.gmra.mxu1 %vm177_vm1, %v167_v25  ;;  %v468_v25 = vld [vmem:[%s771_s5] ss:$0 sm:$0xff] }
  0x86   :  { %v105_v26 = vpop.f32.mrf.mxu0 }
  0x87   :  { %v130_v36 = vsel %vm129_vm2, %v105_v26, -inf }
  0x8d   :  { %v120_v27 = vpop.f32.mrf.mxu2 }
  0x8e   :  { %v108_v28 = vpop.f32.mrf.mxu0  ;;  %v144_v53 = vsel %vm129_vm2, %v120_v27, -inf }
  0x8f   :  { %v213_v29 = vpop.f32.mrf.mxu1  ;;  %v131_v39 = vsel %vm129_vm2, %v108_v28, -inf }
  0x90   :  { %v231_v40 = vsel %vm129_vm2, %v213_v29, -inf }
  0x95   :  { %v123_v33 = vpop.f32.mrf.mxu2 }
  0x96   :  { %v111_v30 = vpop.f32.mrf.mxu0  ;;  %v145_v54 = vsel %vm129_vm2, %v123_v33, -inf }
  0x97   :  { %v216_v31 = vpop.f32.mrf.mxu1  ;;  %v132_v35 = vsel %vm129_vm2, %v111_v30, -inf  ;;  %v228_v1 = vpop.f32.mrf.mxu3 }
  0x98   :  { %v133_v43 = vmax.f32 %v130_v36, %v132_v35  ;;  %v232_v48 = vsel %vm129_vm2, %v216_v31, -inf  ;;  %v244_v5 = vsel %vm129_vm2, %v228_v1, -inf  ;;  %v469_v35 = vld [vmem:[%s772_s6] ss:$0 sm:$0xff]  ;;  %s499_s6 = smov [#allocation2]  }
  0x99   :  { %v472_v1 = vld [vmem:[%s780_s14] ss:$0 sm:$0xff]  ;;  %s425_s19 = sshll.u32 %s499_s6, 4  ;;  %s426_s19 = int_to_ptr.vmem [resolvable:$true] %s425_s19 }
  0x9d   :  { %v126_v47 = vpop.f32.mrf.mxu2 }
  0x9e   :  { %v114_v37 = vpop.f32.mrf.mxu0  ;;  %v147_v55 = vsel %vm129_vm2, %v126_v47, -inf  ;;  %v357_v47 = vld [vmem:[%s778_s12 + $0x8] sm:$0xff] }
  0x9f   :  { %v219_v38 = vpop.f32.mrf.mxu1  ;;  %v134_v41 = vsel %vm129_vm2, %v114_v37, -inf  ;;  %v148_v63 = vmax.f32 %v144_v53, %v147_v55  ;;  %v470_v53 = vld [vmem:[%s775_s9] ss:$0 sm:$0xff] }
  0xa0   :  { %v233_v42 = vsel %vm129_vm2, %v219_v38, -inf  ;;  %v135_v44 = vmax.f32 %v131_v39, %v134_v41  ;;  %v367_v41 = vld [vmem:[%s779_s13 + $0x38] sm:$0xff] }
  0xa1   :  { %v234_v45 = vmax.f32 %v231_v40, %v233_v42  ;;  %v321_v40 = vld [vmem:[%s768_s2] sm:$0x3]  ;;  %379 = vmatpush.msra.mxu3 %v367_v41  ;;  %v366_v42 = vld [vmem:[%s779_s13 + $0x30] sm:$0xff] }
  0xa2   :  { %v136_v46 = vmax.f32 %v133_v43, %v135_v44  ;;  %v359_v43 = vld [vmem:[%s778_s12 + $0x18] sm:$0xff]  ;;  %v365_v44 = vld [vmem:[%s779_s13 + $0x28] sm:$0xff] }
  0xa3   :  { %v235_v52 = vmax.f32 %v234_v45, %v232_v48  ;;  %380 = vmatpush.msra.mxu3 %v366_v42  ;;  %v358_v45 = vld [vmem:[%s778_s12 + $0x10] sm:$0xff]  ;;  %v363_v48 = vld [vmem:[%s779_s13 + $0x18] sm:$0xff] }
  0xa4   :  { %v137_v51 = vrot.slane %v136_v46, 4 }
  0xa5   :  { %v236_v62 = vrot.slane %v235_v52, 4  ;;  %381 = vmatpush.msra.mxu3 %v365_v44 }
  0xa6   :  { %v138_v57 = vmax.f32 %v136_v46, %v137_v51  ;;  %v117_v58 = vpop.f32.mrf.mxu0  ;;  %v364_v46 = vld [vmem:[%s779_s13 + $0x20] sm:$0xff]  ;;  %v361_v51 = vld [vmem:[%s779_s13 + $0x8] sm:$0xff] }
  0xa7   :  { %v222_v59 = vpop.f32.mrf.mxu1  ;;  %v143_v60 = vsel %vm129_vm2, %v117_v58, -inf  ;;  %v237_v6 = vmax.f32 %v235_v52, %v236_v62  ;;  %382 = vmatpush.msra.mxu3 %v364_v46  ;;  %v360_v52 = vld [vmem:[%s779_s13] sm:$0xff] }
  0xa8   :  { %v146_v0 = vmax.f32 %v143_v60, %v145_v54  ;;  %v139_v2 = vrot.slane %v138_v57, 2  ;;  %v242_v4 = vsel %vm129_vm2, %v222_v59, -inf  ;;  %v471_v59 = vld [vmem:[%s777_s11] ss:$0 sm:$0xff] }
  0xa9   :  { %v245_v10 = vmax.f32 %v242_v4, %v244_v5  ;;  %v238_v13 = vrot.slane %v237_v6, 2  ;;  %383 = vmatpush.msra.mxu3 %v363_v48 }
  0xaa   :  { %v149_v3 = vmax.f32 %v146_v0, %v148_v63  ;;  %v140_v8 = vmax.f32 %v138_v57, %v139_v2 }
  0xab   :  { %v239_v19 = vmax.f32 %v237_v6, %v238_v13  ;;  %384 = vmatpush.msra.mxu3 %v362_v50 }
  0xac   :  { %v150_v7 = vrot.slane %v149_v3, 4  ;;  %v141_v16 = vrot.slane %v140_v8, 1 }
  0xad   :  { %v240_v26 = vrot.slane %v239_v19, 1  ;;  %385 = vmatpush.msra.mxu3 %v361_v51 }
  0xae   :  { %v151_v9 = vmax.f32 %v149_v3, %v150_v7  ;;  %v142_v22 = vmax.f32 %v140_v8, %v141_v16 }
  0xaf   :  { %v225_v11 = vpop.f32.mrf.mxu1  ;;  %v241_v32 = vmax.f32 %v239_v19, %v240_v26  ;;  %386 = vmatpush.msra.mxu3 %v360_v52 }
  0xb0   :  { %v243_v12 = vsel %vm129_vm2, %v225_v11, -inf  ;;  %v152_v14 = vrot.slane %v151_v9, 2  ;;  %v160_v30 = vadd.f32 %v468_v25, %v142_v22 }
  0xb1   :  { %v246_v15 = vmax.f32 %v245_v10, %v243_v12  ;;  %v257_v37 = vadd.f32 %v469_v35, %v241_v32 }
  0xb2   :  { %v153_v17 = vmax.f32 %v151_v9, %v152_v14 }
  0xb3   :  { %v247_v18 = vrot.slane %v246_v15, 4 }
  0xb4   :  { %v154_v20 = vrot.slane %v153_v17, 1 }
  0xb5   :  { %v248_v21 = vmax.f32 %v246_v15, %v247_v18 }
  0xb6   :  { %v155_v23 = vmax.f32 %v153_v17, %v154_v20 }
  0xb7   :  { %v249_v24 = vrot.slane %v248_v21, 2 }
  0xb8   :  { %v161_v28 = vadd.f32 %v468_v25, %v155_v23 }
  0xb9   :  { %v250_v27 = vmax.f32 %v248_v21, %v249_v24 }
  0xba   :  { %v289_v31 = vrot.slane %v161_v28, 7 }
  0xbb   :  { %v251_v29 = vrot.slane %v250_v27, 1 }
  0xbc   :  { %v290_v34 = vsel %vm263_vm3, %v289_v31, %v160_v30 }
  0xbd   :  { %v252_v33 = vmax.f32 %v250_v27, %v251_v29  ;;  %451 = vmatmul.msk.f32.vlgmr.msrb.gmra.mxu3 %vm129_vm2, %v290_v34 }
  0xbf   :  { %v258_v36 = vadd.f32 %v469_v35, %v252_v33 }
  0xc1   :  { %v262_v38 = vrot.slane %v258_v36, 7 }
  0xc3   :  { %v264_v39 = vsel %vm263_vm3, %v262_v38, %v257_v37 }
  0xc4   :  { %450 = vmatmul.msk.f32.vlgmr.msrb.gmra.mxu2 %vm129_vm2, %v264_v39 }
  0xc5   :  { %406 = vmatpush.msrb.mxu2 %v359_v43 }
  0xc7   :  { %407 = vmatpush.msrb.mxu2 %v358_v45 }
  0xc9   :  { %408 = vmatpush.msrb.mxu2 %v357_v47 }
  0xcb   :  { %409 = vmatpush.msrb.mxu2 %v356_v49 }
  0xcc   :  { %452 = vmatmul.msk.f32.vlgmr.msra.gmra.mxu2 %vm63_vm0, %v321_v40 }
 0x140   :  { %v310_v54 = vpop.f32.mrf.mxu3 }
 0x147   :  { %v284_v55 = vpop.f32.mrf.mxu2 }
 0x148   :  { %v311_v56 = vadd.f32 %v310_v54, %v284_v55 }
 0x14a   :  { %v317_v57 = vadd.f32 %v470_v53, %v311_v56 }
 0x14c   :  { %vm318_vm4 = vcmp.gt.f32.partialorder %v317_v57, 0.0  ;;  %v319_v58 = vmul.f32 0.01, %v317_v57 }
 0x14e   :  { %v320_v60 = vsel %vm318_vm4, %v317_v57, %v319_v58 }
 0x14f   :  { %v350_v61 = vpop.f32.mrf.mxu2  ;;  %454 = vmatmul.msk.f32.vlgmr.msrb.gmra.mxu2 %vm63_vm0, %v320_v60 }
 0x150   :  { %v351_v62 = vadd.f32 %v471_v59, %v350_v61 }
 0x152   :  { %vm353_vm5 = vcmp.gt.f32.partialorder %v351_v62, 0.0  ;;  %v354_v63 = vmul.f32 0.01, %v351_v62 }
 0x154   :  { %v355_v0 = vsel %vm353_vm5, %v351_v62, %v354_v63 }
 0x155   :  { %453 = vmatmul.msk.f32.vlgmr.msra.gmra.mxu3 %vm177_vm1, %v355_v0 }
 0x1d2   :  { %v411_v2 = vpop.f32.mrf.mxu2 }
 0x1d8   :  { %v388_v3 = vpop.f32.mrf.mxu3 }
 0x1d9   :  { %v412_v4 = vadd.f32 %v411_v2, %v388_v3 }
 0x1db   :  { %v418_v5 = vadd.f32 %v472_v1, %v412_v4 }
 0x1dd   :  { %419 = vst [vmem:[#allocation2] sm:$0x3] %v418_v5 }
 0x1de   :  { %430 = dma.vmem_to_hbm [thread:$0]  %s426_s19, 32, %s428_s4, [#allocation3]  }
 0x1df   :  { %497 = dma.done.wait [#allocation3], 32  }
 0x1e0   :  { %498 = vsyncadd [#allocation3], 4294967264 }
 0x1e1   :  { %435 = vsyncpa [#allocation3], 1 }

</bundles_post_ra>
